<compile_context>
chip_gen: v7x
topology: tpu7x:2x2x1
jax: 0.10.0
libtpu: 0.0.40
codegen_flags: <defaults>
</compile_context>

<pallas_src>
import functools

import jax
import jax.numpy as jnp
import numpy as np
from jax.experimental import pallas as pl
from jax.experimental.pallas import tpu as pltpu


# ----------------------------------------------------------------------------
# Kernel 1: SAGEConv layer 1 over a (row-strip, k-panel) grid point.
#   acc  += A_ind[i, k] @ (x @ Wl1x)[k]                      (K accumulation)
#   at last k:
#     h1   = relu(invdeg * acc + selfterm1)                  (selfterm1 holds
#            x@Wr1x + rowsum*(temb@Wl1t) + temb@Wr1t + bl1)
#     h1w  = h1 @ Wl2            (layer-2 aggregation operand, bf16)
#     h1r  = h1 @ Wr2 + bl2      (layer-2 self term, f32)
# ----------------------------------------------------------------------------
def sage_layer1_kernel(a_ref, xwl_ref, invdeg_ref, self_ref, wl2_ref, wr2_ref,
                       b2_ref, h1w_ref, h1r_ref, acc_ref):
    k = pl.program_id(1)

    @pl.when(k == 0)
    def _():
        acc_ref[...] = jnp.zeros_like(acc_ref)

    acc_ref[...] += jnp.dot(a_ref[...], xwl_ref[...],
                            preferred_element_type=jnp.float32)

    @pl.when(k == pl.num_programs(1) - 1)
    def _():
        h1 = jnp.maximum(acc_ref[...] * invdeg_ref[...] + self_ref[...], 0.0)
        h1_bf = h1.astype(jnp.bfloat16)
        h1w_ref[...] = jnp.dot(h1_bf, wl2_ref[...],
                               preferred_element_type=jnp.float32
                               ).astype(h1w_ref.dtype)
        h1r_ref[...] = (jnp.dot(h1_bf, wr2_ref[...],
                                preferred_element_type=jnp.float32)
                        + b2_ref[...]).astype(h1r_ref.dtype)


# ----------------------------------------------------------------------------
# Kernel 2: SAGEConv layer 2 + output head over a (row-strip, k-panel) point.
#   acc += A_ind[i, k] @ h1w[k]
#   at last k:
#     h2  = relu(invdeg * acc + h1r_strip)
#     out = sum(h2 * wo_row, -1) + bo        (VPU/XLU reduce, no 1-col MXU)
# ----------------------------------------------------------------------------
def sage_layer2_kernel(a_ref, h1w_ref, invdeg_ref, self_ref, wo_ref, bo_ref,
                       o_ref, acc_ref):
    k = pl.program_id(1)

    @pl.when(k == 0)
    def _():
        acc_ref[...] = jnp.zeros_like(acc_ref)

    acc_ref[...] += jnp.dot(a_ref[...], h1w_ref[...],
                            preferred_element_type=jnp.float32)

    @pl.when(k == pl.num_programs(1) - 1)
    def _():
        h2 = jnp.maximum(acc_ref[...] * invdeg_ref[...] + self_ref[...], 0.0)
        o_ref[...] = (jnp.sum(h2 * wo_ref[...], axis=-1, keepdims=True)
                      + bo_ref[...])


# ----------------------------------------------------------------------------
# Parameters (shapes match the torch module) and graph preprocessing.
# ----------------------------------------------------------------------------
def make_params(key, in_dim, hidden_dim, T):
    ks = jax.random.split(key, 12)
    s = 0.1
    p = {}
    p["embed"] = jax.random.normal(ks[0], (T, hidden_dim), jnp.float32) * s
    p["wt1"] = jax.random.normal(ks[1], (hidden_dim, hidden_dim), jnp.float32) * s
    p["bt1"] = jax.random.normal(ks[2], (1, hidden_dim), jnp.float32) * s
    p["wt2"] = jax.random.normal(ks[3], (hidden_dim, hidden_dim), jnp.float32) * s
    p["bt2"] = jax.random.normal(ks[4], (1, hidden_dim), jnp.float32) * s
    cat_dim = in_dim + hidden_dim
    p["wl1"] = jax.random.normal(ks[5], (cat_dim, hidden_dim), jnp.float32) * s
    p["bl1"] = jax.random.normal(ks[6], (1, hidden_dim), jnp.float32) * s
    p["wr1"] = jax.random.normal(ks[7], (cat_dim, hidden_dim), jnp.float32) * s
    p["wl2"] = jax.random.normal(ks[8], (hidden_dim, hidden_dim), jnp.float32) * s
    p["bl2"] = jax.random.normal(ks[9], (1, hidden_dim), jnp.float32) * s
    p["wr2"] = jax.random.normal(ks[10], (hidden_dim, hidden_dim), jnp.float32) * s
    p["wo"] = jax.random.normal(ks[11], (hidden_dim, 1), jnp.float32) * s
    p["bo"] = jnp.zeros((1, 1), jnp.float32)
    return p


def build_indicator_adjacency(edge_index, num_nodes):
    """A_ind[i,j] = count(j->i) built DIRECTLY in bf16 (counts are exact),
    plus exact f32 per-row 1/deg and a (deg>0) indicator column."""
    # TODO(synk): for E << N^2 a scalar-prefetch gather/segment-sum formulation
    # would avoid the dense O(N^2) adjacency; dense indicator A is used here.
    # TODO(synk): on v7x an fp8 0/1 indicator would halve the dominant A
    # stream again; kept bf16 so the mixed-dtype matmul lowers on all gens.
    src, dst = edge_index[0], edge_index[1]
    ones = jnp.ones(src.shape[0], jnp.float32)
    deg = jnp.zeros((num_nodes,), jnp.float32).at[dst].add(ones)
    A = (jnp.zeros((num_nodes, num_nodes), jnp.bfloat16)
         .at[dst, src].add(jnp.ones(src.shape[0], jnp.bfloat16)))
    invdeg = (1.0 / jnp.maximum(deg, 1.0))[:, None]            # [N,1] f32, exact
    rowsum = (deg > 0).astype(jnp.float32)[:, None]            # rowsum(mean-A)
    return A, invdeg, rowsum


# ----------------------------------------------------------------------------
# VMEM accounting & tile selection (lane padding to 128, double buffers,
# scratch, outputs).  Explicit vmem_limit_bytes fits v5e/v6e (128 MiB phys)
# and v7x (64 MiB phys) alike.
# ----------------------------------------------------------------------------
_VMEM_LIMIT_BYTES = 48 << 20        # explicit scoped-VMEM limit for both calls
_RESIDENT_BUDGET_BYTES = 28 << 20   # target for streamed per-call residency


def _round_up(x, m):
    return (x + m - 1) // m * m


def _estimate_vmem(tm, tk, n_buf_a=2):
    """Conservative per-call VMEM estimate (layer 1 is the larger of the two)."""
    lane = 128
    a_blk = n_buf_a * tm * _round_up(tk, lane) * 2        # A strip blocks (bf16)
    panel = 2 * _round_up(tk, 16) * lane * 2              # agg-operand k-panel (bf16)
    acc = tm * lane * 4                                    # f32 accumulator scratch
    strips = 2 * 2 * tm * lane * 4                         # invdeg + self-term strips
    outs = 2 * (tm * lane * 2 + tm * lane * 4)             # h1w (bf16) + h1r/out (f32)
    consts = 1 << 20                                       # weight/bias blocks + slack
    return a_blk + panel + acc + strips + outs + consts


def _pick_tiles(n):
    # k panel: largest multiple of 128 dividing n (lane-aligned A blocks),
    # else stream the whole row (tk == n is always a legal block dim).
    tk = n
    for cand in (2048, 1024, 512, 256, 128):
        if n % cand == 0:
            tk = cand
            break
    # row strip: largest multiple of 16 dividing n whose residency fits budget.
    for tm in (1024, 512, 256, 128, 64, 32, 16):
        if n % tm == 0 and _estimate_vmem(tm, tk) <= _RESIDENT_BUDGET_BYTES:
            return tm, tk
    # TODO(synk): pad N up to a multiple of 16 (rows) / 128 (k) for arbitrary
    # node counts instead of falling back to a single tile.
    return n, tk


# ----------------------------------------------------------------------------
# Forward wrapper.
# ----------------------------------------------------------------------------
@functools.partial(jax.jit, static_argnames=("num_nodes", "tile_m", "tile_k"))
def diffusion_gnn_forward(params, x, edge_index, t, num_nodes,
                          tile_m=None, tile_k=None):
    in_dim = x.shape[1]
    hidden = params["wt1"].shape[0]
    if tile_m is None or tile_k is None:
        auto_m, auto_k = _pick_tiles(num_nodes)
        tile_m = tile_m or auto_m
        tile_k = tile_k or auto_k
    assert num_nodes % tile_m == 0 and num_nodes % tile_k == 0
    grid = (num_nodes // tile_m, num_nodes // tile_k)

    f32, bf16 = jnp.float32, jnp.bfloat16

    # ---- Hoisted TimeEmbedding MLP (N-independent 1-row matmuls) ----
    te = params["embed"][t[0]][None, :]                       # [1, H]
    th = te @ params["wt1"] + params["bt1"]
    th = th * jax.nn.sigmoid(th)                              # SiLU
    temb = th @ params["wt2"] + params["bt2"]                 # [1, H]

    # ---- Rank-1 temb algebra + reassociated projections (wrapper-side) ----
    wl1x, wl1t = params["wl1"][:in_dim], params["wl1"][in_dim:]
    wr1x, wr1t = params["wr1"][:in_dim], params["wr1"][in_dim:]
    tl = temb @ wl1t                                          # lin_l temb term
    xwl = (x @ wl1x).astype(bf16)                             # [N,H] agg operand
    self1 = x @ wr1x + params["bl1"] + temb @ wr1t            # [N,H] f32

    A_ind, invdeg, rowsum = build_indicator_adjacency(edge_index, num_nodes)
    self1 = self1 + rowsum * tl                               # fold rank-1 agg term

    wl2_bf = params["wl2"].astype(bf16)
    wr2_bf = params["wr2"].astype(bf16)
    wo_row = params["wo"].T                                   # [1, H] f32
    bo = params["bo"]

    row = lambda r, c: pl.BlockSpec((r, c), lambda i, k: (i, 0))   # per-row-strip
    panel = lambda r, c: pl.BlockSpec((r, c), lambda i, k: (k, 0))  # per-k-panel
    const = lambda shape: pl.BlockSpec(shape, lambda i, k: (0, 0))  # grid-invariant
    a_spec = pl.BlockSpec((tile_m, tile_k), lambda i, k: (i, k))
    # TODO(synk): on v7x consider pipeline_mode=pl.Buffered(3) for a_spec (DMA
    # and MXU times are closely matched at 3.2 TB/s HBM).
    cparams = pltpu.CompilerParams(
        dimension_semantics=("parallel", "arbitrary"),
        vmem_limit_bytes=_VMEM_LIMIT_BYTES)

    # ---- Layer 1: A_strip @ (x@Wl1x) with K accumulation; emits both
    #      layer-2 operands (h1@Wl2 bf16, h1@Wr2+bl2 f32). ----
    h1w, h1r = pl.pallas_call(
        sage_layer1_kernel,
        out_shape=(jax.ShapeDtypeStruct((num_nodes, hidden), bf16),
                   jax.ShapeDtypeStruct((num_nodes, hidden), f32)),
        grid=grid,
        in_specs=[
            a_spec,                         # A indicator strip (streamed, bf16)
            panel(tile_k, hidden),          # (x @ Wl1x) k-panel (bf16)
            row(tile_m, 1),                 # 1/deg column (f32)
            row(tile_m, hidden),            # folded self/bias/temb term (f32)
            const((hidden, hidden)),        # Wl2 (bf16)
            const((hidden, hidden)),        # Wr2 (bf16)
            const((1, hidden)),             # bl2
        ],
        out_specs=[row(tile_m, hidden), row(tile_m, hidden)],
        scratch_shapes=[pltpu.VMEM((tile_m, hidden), f32)],
        compiler_params=cparams,
    )(A_ind, xwl, invdeg, self1, wl2_bf, wr2_bf, params["bl2"])

    # ---- Layer 2 + head: A_strip @ (h1@Wl2) with K accumulation. ----
    out = pl.pallas_call(
        sage_layer2_kernel,
        out_shape=jax.ShapeDtypeStruct((num_nodes, 1), f32),
        grid=grid,
        in_specs=[
            a_spec,                         # A indicator strip (streamed, bf16)
            panel(tile_k, hidden),          # h1 @ Wl2 k-panel (bf16)
            row(tile_m, 1),                 # 1/deg column (f32)
            row(tile_m, hidden),            # h1 @ Wr2 + bl2 strip (f32)
            const((1, hidden)),             # wo as a row
            const((1, 1)),                  # bo
        ],
        out_specs=row(tile_m, 1),
        scratch_shapes=[pltpu.VMEM((tile_m, hidden), f32)],
        compiler_params=cparams,
    )(A_ind, h1w, invdeg, h1r, wo_row, bo)

    return out[:, 0]                                          # squeeze(-1) -> [N]


# ----------------------------------------------------------------------------
# Pure-JAX f32 reference (same math as the torch module) for a sanity check.
# ----------------------------------------------------------------------------
def reference_forward(params, x, edge_index, t, num_nodes):
    te = params["embed"][t[0]][None, :]
    th = te @ params["wt1"] + params["bt1"]
    th = th * jax.nn.sigmoid(th)
    temb = th @ params["wt2"] + params["bt2"]
    xin = jnp.concatenate(
        [x, jnp.broadcast_to(temb, (num_nodes, temb.shape[1]))], -1)
    src, dst = edge_index[0], edge_index[1]
    deg = jnp.zeros((num_nodes,), jnp.float32).at[dst].add(1.0)
    A = jnp.zeros((num_nodes, num_nodes), jnp.float32).at[dst, src].add(1.0)
    A = A / jnp.maximum(deg, 1.0)[:, None]
    h = jnp.maximum(A @ xin @ params["wl1"] + params["bl1"]
                    + xin @ params["wr1"], 0.0)
    h = jnp.maximum(A @ h @ params["wl2"] + params["bl2"]
                    + h @ params["wr2"], 0.0)
    return (h @ params["wo"] + params["bo"])[:, 0]


if __name__ == "__main__":
    # Small deterministic example; N chosen so both grid axes have >1 tile
    # (row strips of 64, k panels of 128 -> grid (4, 2)).
    N, IN_DIM, HIDDEN, T, E, B = 256, 8, 32, 10, 1024, 2

    key = jax.random.PRNGKey(0)
    k_x, k_e, k_t, k_p = jax.random.split(key, 4)

    x = jax.random.normal(k_x, (N, IN_DIM), jnp.float32)
    edge_index = jax.random.randint(k_e, (2, E), 0, N, jnp.int32)
    t = jax.random.randint(k_t, (B,), 0, T, jnp.int32)
    params = make_params(k_p, IN_DIM, HIDDEN, T)

    out = diffusion_gnn_forward(params, x, edge_index, t, num_nodes=N,
                                tile_m=64, tile_k=128)
    jax.block_until_ready(out)

    ref = reference_forward(params, x, edge_index, t, N)
    assert out.shape == (N,)
    np.testing.assert_allclose(np.asarray(out), np.asarray(ref),
                               rtol=2e-2, atol=2e-2)

    print("KERNEL_OK")
</pallas_src>

<mosaic_0001>
module attributes {stable_mosaic.version = 11 : i64} {
  func.func private @main(%arg0: i32) attributes {dimension_semantics = [#tpu.dimension_semantics<core_parallel>], iteration_bounds = array<i64: 2>, tpu.core_type = #tpu.core_type<sc_scalar_subcore>, window_params = []} {
    return
  }
}

module attributes {stable_mosaic.version = 11 : i64} {
  func.func private @main(%arg0: i32) attributes {dimension_semantics = [#tpu.dimension_semantics<core_parallel>], iteration_bounds = array<i64: 2>, tpu.core_type = #tpu.core_type<sc_scalar_subcore>, window_params = []} {
    return
  }
}

module attributes {stable_mosaic.version = 11 : i64} {
  func.func @sage_layer2_kernel(%arg0: i32, %arg1: i32, %arg2: memref<64x128xbf16, #tpu.memory_space<vmem>>, %arg3: memref<128x32xbf16, #tpu.memory_space<vmem>>, %arg4: memref<64x1xf32, #tpu.memory_space<vmem>>, %arg5: memref<64x32xf32, #tpu.memory_space<vmem>>, %arg6: memref<1x32xf32, #tpu.memory_space<vmem>>, %arg7: memref<1x1xf32, #tpu.memory_space<vmem>>, %arg8: memref<64x1xf32, #tpu.memory_space<vmem>>, %arg9: memref<64x32xf32, #tpu.memory_space<vmem>>) attributes {dimension_semantics = [#tpu.dimension_semantics<parallel>, #tpu.dimension_semantics<arbitrary>], iteration_bounds = array<i64: 4, 2>, scalar_prefetch = 0 : i64, scratch_operands = 1 : i64, tpu.core_type = #tpu.core_type<tc>, window_params = [{transform_indices = @transform_0, window_bounds = array<i64: 64, 128>}, {transform_indices = @transform_1, window_bounds = array<i64: 128, 32>}, {transform_indices = @transform_2, window_bounds = array<i64: 64, 1>}, {transform_indices = @transform_3, window_bounds = array<i64: 64, 32>}, {pipeline_mode = #tpu.pipeline_mode<synchronous>, transform_indices = @transform_4, window_bounds = array<i64: 1, 32>}, {pipeline_mode = #tpu.pipeline_mode<synchronous>, transform_indices = @transform_5, window_bounds = array<i64: 1, 1>}, {transform_indices = @transform_6, window_bounds = array<i64: 64, 1>}]} {
    %c0_i32 = arith.constant 0 : i32
    %0 = arith.cmpi eq, %arg1, %c0_i32 : i32
    %1 = arith.extui %0 : i1 to i32
    %c0_i32_0 = arith.constant 0 : i32
    %2 = arith.cmpi ne, %1, %c0_i32_0 : i32
    scf.if %2 {
      %cst_9 = arith.constant 0.000000e+00 : f32
      %12 = vector.broadcast %cst_9 : f32 to vector<64x32xf32>
      %c0_10 = arith.constant 0 : index
      %c0_11 = arith.constant 0 : index
      %13 = vector.load %arg9[%c0_10, %c0_11] : memref<64x32xf32, #tpu.memory_space<vmem>>, vector<64x32xf32>
      tpu.vector_store %arg9[%c0_10, %c0_11], %12 {strides = array<i32>} : memref<64x32xf32, #tpu.memory_space<vmem>>, vector<64x32xf32>,
    } else {
    }
    %c0 = arith.constant 0 : index
    %c0_1 = arith.constant 0 : index
    %3 = vector.load %arg9[%c0, %c0_1] : memref<64x32xf32, #tpu.memory_space<vmem>>, vector<64x32xf32>
    %c0_2 = arith.constant 0 : index
    %c0_3 = arith.constant 0 : index
    %4 = vector.load %arg2[%c0_2, %c0_3] : memref<64x128xbf16, #tpu.memory_space<vmem>>, vector<64x128xbf16>
    %c0_4 = arith.constant 0 : index
    %c0_5 = arith.constant 0 : index
    %5 = vector.load %arg3[%c0_4, %c0_5] : memref<128x32xbf16, #tpu.memory_space<vmem>>, vector<128x32xbf16>
    %cst = arith.constant dense<0.000000e+00> : vector<64x32xf32>
    %6 = tpu.matmul %4, %5, %cst {dimension_numbers = #tpu.dot_dimension_numbers<[1], [0], [0], [1], [0, 0, 1, 1], [], []>} : vector<64x128xbf16>, vector<128x32xbf16>, vector<64x32xf32> -> vector<64x32xf32>
    %7 = arith.addf %3, %6 : vector<64x32xf32>
    %c0_6 = arith.constant 0 : index
    %c0_7 = arith.constant 0 : index
    %8 = vector.load %arg9[%c0_6, %c0_7] : memref<64x32xf32, #tpu.memory_space<vmem>>, vector<64x32xf32>
    tpu.vector_store %arg9[%c0_6, %c0_7], %7 {strides = array<i32>} : memref<64x32xf32, #tpu.memory_space<vmem>>, vector<64x32xf32>,
    %c1_i32 = arith.constant 1 : i32
    %9 = arith.cmpi eq, %arg1, %c1_i32 : i32
    %10 = arith.extui %9 : i1 to i32
    %c0_i32_8 = arith.constant 0 : i32
    %11 = arith.cmpi ne, %10, %c0_i32_8 : i32
    scf.if %11 {
      %c0_9 = arith.constant 0 : index
      %c0_10 = arith.constant 0 : index
      %12 = vector.load %arg9[%c0_9, %c0_10] : memref<64x32xf32, #tpu.memory_space<vmem>>, vector<64x32xf32>
      %c0_11 = arith.constant 0 : index
      %c0_12 = arith.constant 0 : index
      %13 = vector.load %arg4[%c0_11, %c0_12] : memref<64x1xf32, #tpu.memory_space<vmem>>, vector<64x1xf32>
      %14 = vector.broadcast %13 : vector<64x1xf32> to vector<64x32xf32>
      %15 = arith.mulf %12, %14 : vector<64x32xf32>
      %c0_13 = arith.constant 0 : index
      %c0_14 = arith.constant 0 : index
      %16 = vector.load %arg5[%c0_13, %c0_14] : memref<64x32xf32, #tpu.memory_space<vmem>>, vector<64x32xf32>
      %17 = arith.addf %15, %16 : vector<64x32xf32>
      %cst_15 = arith.constant 0.000000e+00 : f32
      %18 = vector.broadcast %cst_15 : f32 to vector<64x32xf32>
      %19 = arith.maximumf %17, %18 : vector<64x32xf32>
      %c0_16 = arith.constant 0 : index
      %c0_17 = arith.constant 0 : index
      %20 = vector.load %arg6[%c0_16, %c0_17] : memref<1x32xf32, #tpu.memory_space<vmem>>, vector<1x32xf32>
      %21 = vector.broadcast %20 : vector<1x32xf32> to vector<64x32xf32>
      %22 = arith.mulf %19, %21 : vector<64x32xf32>
      %cst_18 = arith.constant dense<0.000000e+00> : vector<64xf32>
      %23 = vector.multi_reduction <add>, %22, %cst_18 [1] : vector<64x32xf32> to vector<64xf32>
      %24 = vector.shape_cast %23 : vector<64xf32> to vector<64x1xf32>
      %c0_19 = arith.constant 0 : index
      %c0_20 = arith.constant 0 : index
      %25 = vector.load %arg7[%c0_19, %c0_20] : memref<1x1xf32, #tpu.memory_space<vmem>>, vector<1x1xf32>
      %26 = vector.broadcast %25 : vector<1x1xf32> to vector<64x1xf32>
      %27 = arith.addf %24, %26 : vector<64x1xf32>
      %c0_21 = arith.constant 0 : index
      %c0_22 = arith.constant 0 : index
      %28 = vector.load %arg8[%c0_21, %c0_22] : memref<64x1xf32, #tpu.memory_space<vmem>>, vector<64x1xf32>
      tpu.vector_store %arg8[%c0_21, %c0_22], %27 {strides = array<i32>} : memref<64x1xf32, #tpu.memory_space<vmem>>, vector<64x1xf32>,
    } else {
    }
    return
  }
  func.func @transform_0(%arg0: i32, %arg1: i32) -> (i32, i32) {
    %c0_i32 = arith.constant 0 : i32
    return %arg0, %arg1 : i32, i32
  }
  func.func @transform_1(%arg0: i32, %arg1: i32) -> (i32, i32) {
    %c0_i32 = arith.constant 0 : i32
    %c0_i32_0 = arith.constant 0 : i32
    return %arg1, %c0_i32 : i32, i32
  }
  func.func @transform_2(%arg0: i32, %arg1: i32) -> (i32, i32) {
    %c0_i32 = arith.constant 0 : i32
    %c0_i32_0 = arith.constant 0 : i32
    return %arg0, %c0_i32 : i32, i32
  }
  func.func @transform_3(%arg0: i32, %arg1: i32) -> (i32, i32) {
    %c0_i32 = arith.constant 0 : i32
    %c0_i32_0 = arith.constant 0 : i32
    return %arg0, %c0_i32 : i32, i32
  }
  func.func @transform_4(%arg0: i32, %arg1: i32) -> (i32, i32) {
    %c0_i32 = arith.constant 0 : i32
    %c0_i32_0 = arith.constant 0 : i32
    %c0_i32_1 = arith.constant 0 : i32
    return %c0_i32, %c0_i32_0 : i32, i32
  }
  func.func @transform_5(%arg0: i32, %arg1: i32) -> (i32, i32) {
    %c0_i32 = arith.constant 0 : i32
    %c0_i32_0 = arith.constant 0 : i32
    %c0_i32_1 = arith.constant 0 : i32
    return %c0_i32, %c0_i32_0 : i32, i32
  }
  func.func @transform_6(%arg0: i32, %arg1: i32) -> (i32, i32) {
    %c0_i32 = arith.constant 0 : i32
    %c0_i32_0 = arith.constant 0 : i32
    return %arg0, %c0_i32 : i32, i32
  }
}

module attributes {stable_mosaic.version = 11 : i64} {
  func.func @sage_layer1_kernel(%arg0: i32, %arg1: i32, %arg2: memref<64x128xbf16, #tpu.memory_space<vmem>>, %arg3: memref<128x32xbf16, #tpu.memory_space<vmem>>, %arg4: memref<64x1xf32, #tpu.memory_space<vmem>>, %arg5: memref<64x32xf32, #tpu.memory_space<vmem>>, %arg6: memref<32x32xbf16, #tpu.memory_space<vmem>>, %arg7: memref<32x32xbf16, #tpu.memory_space<vmem>>, %arg8: memref<1x32xf32, #tpu.memory_space<vmem>>, %arg9: memref<64x32xbf16, #tpu.memory_space<vmem>>, %arg10: memref<64x32xf32, #tpu.memory_space<vmem>>, %arg11: memref<64x32xf32, #tpu.memory_space<vmem>>) attributes {dimension_semantics = [#tpu.dimension_semantics<parallel>, #tpu.dimension_semantics<arbitrary>], iteration_bounds = array<i64: 4, 2>, scalar_prefetch = 0 : i64, scratch_operands = 1 : i64, tpu.core_type = #tpu.core_type<tc>, window_params = [{transform_indices = @transform_0, window_bounds = array<i64: 64, 128>}, {transform_indices = @transform_1, window_bounds = array<i64: 128, 32>}, {transform_indices = @transform_2, window_bounds = array<i64: 64, 1>}, {transform_indices = @transform_3, window_bounds = array<i64: 64, 32>}, {pipeline_mode = #tpu.pipeline_mode<synchronous>, transform_indices = @transform_4, window_bounds = array<i64: 32, 32>}, {pipeline_mode = #tpu.pipeline_mode<synchronous>, transform_indices = @transform_5, window_bounds = array<i64: 32, 32>}, {pipeline_mode = #tpu.pipeline_mode<synchronous>, transform_indices = @transform_6, window_bounds = array<i64: 1, 32>}, {transform_indices = @transform_7, window_bounds = array<i64: 64, 32>}, {transform_indices = @transform_8, window_bounds = array<i64: 64, 32>}]} {
    %c0_i32 = arith.constant 0 : i32
    %0 = arith.cmpi eq, %arg1, %c0_i32 : i32
    %1 = arith.extui %0 : i1 to i32
    %c0_i32_0 = arith.constant 0 : i32
    %2 = arith.cmpi ne, %1, %c0_i32_0 : i32
    scf.if %2 {
      %cst_9 = arith.constant 0.000000e+00 : f32
      %12 = vector.broadcast %cst_9 : f32 to vector<64x32xf32>
      %c0_10 = arith.constant 0 : index
      %c0_11 = arith.constant 0 : index
      %13 = vector.load %arg11[%c0_10, %c0_11] : memref<64x32xf32, #tpu.memory_space<vmem>>, vector<64x32xf32>
      tpu.vector_store %arg11[%c0_10, %c0_11], %12 {strides = array<i32>} : memref<64x32xf32, #tpu.memory_space<vmem>>, vector<64x32xf32>,
    } else {
    }
    %c0 = arith.constant 0 : index
    %c0_1 = arith.constant 0 : index
    %3 = vector.load %arg11[%c0, %c0_1] : memref<64x32xf32, #tpu.memory_space<vmem>>, vector<64x32xf32>
    %c0_2 = arith.constant 0 : index
    %c0_3 = arith.constant 0 : index
    %4 = vector.load %arg2[%c0_2, %c0_3] : memref<64x128xbf16, #tpu.memory_space<vmem>>, vector<64x128xbf16>
    %c0_4 = arith.constant 0 : index
    %c0_5 = arith.constant 0 : index
    %5 = vector.load %arg3[%c0_4, %c0_5] : memref<128x32xbf16, #tpu.memory_space<vmem>>, vector<128x32xbf16>
    %cst = arith.constant dense<0.000000e+00> : vector<64x32xf32>
    %6 = tpu.matmul %4, %5, %cst {dimension_numbers = #tpu.dot_dimension_numbers<[1], [0], [0], [1], [0, 0, 1, 1], [], []>} : vector<64x128xbf16>, vector<128x32xbf16>, vector<64x32xf32> -> vector<64x32xf32>
    %7 = arith.addf %3, %6 : vector<64x32xf32>
    %c0_6 = arith.constant 0 : index
    %c0_7 = arith.constant 0 : index
    %8 = vector.load %arg11[%c0_6, %c0_7] : memref<64x32xf32, #tpu.memory_space<vmem>>, vector<64x32xf32>
    tpu.vector_store %arg11[%c0_6, %c0_7], %7 {strides = array<i32>} : memref<64x32xf32, #tpu.memory_space<vmem>>, vector<64x32xf32>,
    %c1_i32 = arith.constant 1 : i32
    %9 = arith.cmpi eq, %arg1, %c1_i32 : i32
    %10 = arith.extui %9 : i1 to i32
    %c0_i32_8 = arith.constant 0 : i32
    %11 = arith.cmpi ne, %10, %c0_i32_8 : i32
    scf.if %11 {
      %c0_9 = arith.constant 0 : index
      %c0_10 = arith.constant 0 : index
      %12 = vector.load %arg11[%c0_9, %c0_10] : memref<64x32xf32, #tpu.memory_space<vmem>>, vector<64x32xf32>
      %c0_11 = arith.constant 0 : index
      %c0_12 = arith.constant 0 : index
      %13 = vector.load %arg4[%c0_11, %c0_12] : memref<64x1xf32, #tpu.memory_space<vmem>>, vector<64x1xf32>
      %14 = vector.broadcast %13 : vector<64x1xf32> to vector<64x32xf32>
      %15 = arith.mulf %12, %14 : vector<64x32xf32>
      %c0_13 = arith.constant 0 : index
      %c0_14 = arith.constant 0 : index
      %16 = vector.load %arg5[%c0_13, %c0_14] : memref<64x32xf32, #tpu.memory_space<vmem>>, vector<64x32xf32>
      %17 = arith.addf %15, %16 : vector<64x32xf32>
      %cst_15 = arith.constant 0.000000e+00 : f32
      %18 = vector.broadcast %cst_15 : f32 to vector<64x32xf32>
      %19 = arith.maximumf %17, %18 : vector<64x32xf32>
      %20 = arith.truncf %19 : vector<64x32xf32> to vector<64x32xbf16>
      %c0_16 = arith.constant 0 : index
      %c0_17 = arith.constant 0 : index
      %21 = vector.load %arg6[%c0_16, %c0_17] : memref<32x32xbf16, #tpu.memory_space<vmem>>, vector<32x32xbf16>
      %cst_18 = arith.constant dense<0.000000e+00> : vector<64x32xf32>
      %22 = tpu.matmul %20, %21, %cst_18 {dimension_numbers = #tpu.dot_dimension_numbers<[1], [0], [0], [1], [0, 0, 1, 1], [], []>} : vector<64x32xbf16>, vector<32x32xbf16>, vector<64x32xf32> -> vector<64x32xf32>
      %23 = arith.truncf %22 : vector<64x32xf32> to vector<64x32xbf16>
      %c0_19 = arith.constant 0 : index
      %c0_20 = arith.constant 0 : index
      %24 = vector.load %arg9[%c0_19, %c0_20] : memref<64x32xbf16, #tpu.memory_space<vmem>>, vector<64x32xbf16>
      tpu.vector_store %arg9[%c0_19, %c0_20], %23 {strides = array<i32>} : memref<64x32xbf16, #tpu.memory_space<vmem>>, vector<64x32xbf16>,
      %c0_21 = arith.constant 0 : index
      %c0_22 = arith.constant 0 : index
      %25 = vector.load %arg7[%c0_21, %c0_22] : memref<32x32xbf16, #tpu.memory_space<vmem>>, vector<32x32xbf16>
      %cst_23 = arith.constant dense<0.000000e+00> : vector<64x32xf32>
      %26 = tpu.matmul %20, %25, %cst_23 {dimension_numbers = #tpu.dot_dimension_numbers<[1], [0], [0], [1], [0, 0, 1, 1], [], []>} : vector<64x32xbf16>, vector<32x32xbf16>, vector<64x32xf32> -> vector<64x32xf32>
      %c0_24 = arith.constant 0 : index
      %c0_25 = arith.constant 0 : index
      %27 = vector.load %arg8[%c0_24, %c0_25] : memref<1x32xf32, #tpu.memory_space<vmem>>, vector<1x32xf32>
      %28 = vector.broadcast %27 : vector<1x32xf32> to vector<64x32xf32>
      %29 = arith.addf %26, %28 : vector<64x32xf32>
      %c0_26 = arith.constant 0 : index
      %c0_27 = arith.constant 0 : index
      %30 = vector.load %arg10[%c0_26, %c0_27] : memref<64x32xf32, #tpu.memory_space<vmem>>, vector<64x32xf32>
      tpu.vector_store %arg10[%c0_26, %c0_27], %29 {strides = array<i32>} : memref<64x32xf32, #tpu.memory_space<vmem>>, vector<64x32xf32>,
    } else {
    }
    return
  }
  func.func @transform_0(%arg0: i32, %arg1: i32) -> (i32, i32) {
    %c0_i32 = arith.constant 0 : i32
    return %arg0, %arg1 : i32, i32
  }
  func.func @transform_1(%arg0: i32, %arg1: i32) -> (i32, i32) {
    %c0_i32 = arith.constant 0 : i32
    %c0_i32_0 = arith.constant 0 : i32
    return %arg1, %c0_i32 : i32, i32
  }
  func.func @transform_2(%arg0: i32, %arg1: i32) -> (i32, i32) {
    %c0_i32 = arith.constant 0 : i32
    %c0_i32_0 = arith.constant 0 : i32
    return %arg0, %c0_i32 : i32, i32
  }
  func.func @transform_3(%arg0: i32, %arg1: i32) -> (i32, i32) {
    %c0_i32 = arith.constant 0 : i32
    %c0_i32_0 = arith.constant 0 : i32
    return %arg0, %c0_i32 : i32, i32
  }
  func.func @transform_4(%arg0: i32, %arg1: i32) -> (i32, i32) {
    %c0_i32 = arith.constant 0 : i32
    %c0_i32_0 = arith.constant 0 : i32
    %c0_i32_1 = arith.constant 0 : i32
    return %c0_i32, %c0_i32_0 : i32, i32
  }
  func.func @transform_5(%arg0: i32, %arg1: i32) -> (i32, i32) {
    %c0_i32 = arith.constant 0 : i32
    %c0_i32_0 = arith.constant 0 : i32
    %c0_i32_1 = arith.constant 0 : i32
    return %c0_i32, %c0_i32_0 : i32, i32
  }
  func.func @transform_6(%arg0: i32, %arg1: i32) -> (i32, i32) {
    %c0_i32 = arith.constant 0 : i32
    %c0_i32_0 = arith.constant 0 : i32
    %c0_i32_1 = arith.constant 0 : i32
    return %c0_i32, %c0_i32_0 : i32, i32
  }
  func.func @transform_7(%arg0: i32, %arg1: i32) -> (i32, i32) {
    %c0_i32 = arith.constant 0 : i32
    %c0_i32_0 = arith.constant 0 : i32
    return %arg0, %c0_i32 : i32, i32
  }
  func.func @transform_8(%arg0: i32, %arg1: i32) -> (i32, i32) {
    %c0_i32 = arith.constant 0 : i32
    %c0_i32_0 = arith.constant 0 : i32
    return %arg0, %c0_i32 : i32, i32
  }
}

</mosaic_0001>

<bundles_post_ra>
// kernel: diffusion_gnn_forward.3
= control target key start
LH: loop header
LB: loop body
LE: loop exit
PB: predicated region body
PF: predicated region fallthrough
CT: control target
= control target key end

     0   :  { %s1305_s0 = inlined_call_operand.vmem [shape: bf16[256,256], index: 0, kind: input, shape index: {}]   ;;  %s1306_s1 = inlined_call_operand.vmem [shape: bf16[256,32], index: 1, kind: input, shape index: {}]   ;;  %s1307_s2 = inlined_call_operand.vmem [shape: f32[256,1], index: 2, kind: input, shape index: {}]   ;;  %s1308_s3 = inlined_call_operand.vmem [shape: f32[256,32], index: 3, kind: input, shape index: {}]   ;;  %s1309_s4 = inlined_call_operand.vmem [shape: f32[1,32], index: 4, kind: input, shape index: {}]   ;;  %s1310_s5 = inlined_call_operand.<no memory space> [shape: f32[1,1], index: 5, kind: input, shape index: {}]   ;;  %s1311_s6 = inlined_call_operand.vmem [shape: f32[256,1], index: 6, kind: output, shape index: {}]  }
   0x1   :  { %v11_v0 = vstv %s1310_s5 }
   0x2   :  { %12 = vst [vmem:[#allocation3] sm:$0x1] %v11_v0 }
   0x3   :  { %s1132_s23 = smov 0   ;;  %s1134_s24 = smov 0  }
   0x4   :  { %s1136_s25 = smov 0   ;;  %s1138_s26 = smov 0  }
   0x5   :  { %s1140_s27 = smov 0   ;;  %s1142_s28 = smov 0  }
   0x6   :  { %s1144_s29 = smov 0  }
   0x7 LB: > { %s27_s5 = sadd.s32 1, %s1082_s27  ;;  %s30_s30 = sadd.s32 1, %s1086_s28  ;;  %s1090_s29 = sphi %s1144_s29, %s18_s29   ;;  %s1086_s28 = sphi %s1142_s28, %s1317_s28   ;;  %s1082_s27 = sphi %s1140_s27, %s1316_s27   ;;  %s1078_s26 = sphi %s1138_s26, %s1315_s26   ;;  %s1074_s25 = sphi %s1136_s25, %s1314_s25   ;;  %s1070_s24 = sphi %s1134_s24, %s1313_s24   ;;  %s1066_s23 = sphi %s1132_s23, %s1312_s23  }
   0x8   : > { %p28_p0 = scmp.ge.s32.totalorder %s27_s5, 2  ;;  %p46_p1 = scmp.ne.s32.totalorder %s1070_s24, %s1066_s23 }
   0x9   : > { %p47_p2 = scmp.eq.s32.totalorder %s1090_s29, 0  ;;  %s39_s10 = sadd.s32 1, %s1070_s24 }
   0xa   : > { %s1319_s5 = smov (%p28_p0, %s27_s5), 0  ;;  %s1321_s30 = smov (!%p28_p0, %s30_s30), %s1086_s28 }
   0xb   : > { %p48_p3 = por %p47_p2, %p46_p1  ;;  %p32_p4 = scmp.ge.s32.totalorder %s1321_s30, 4 }
   0xc   : > { %s35_s7 = ssub.s32 %s1082_s27, %s1319_s5  ;;  %p878_p6 = scmp.ge.s32.totalorder %s1090_s29, 8 }
   0xd   : > { %s1323_s30 = smov (%p32_p4, %s1321_s30), 0 }
   0xe   : > { %s34_s8 = ssub.s32 %s1086_s28, %s1323_s30  ;;  %224 = sbr.rel (%p878_p6) target bundleno = 32 (0x20), region = 24 }
   0xf   : > { %s36_s9 = sor.u32 %s35_s7, %s34_s8 }
  0x10   : > { %p37_p5 = scmp.eq.s32.totalorder %s36_s9, 0 }
  0x12   : > { %s1183_s11 = scalar_select %p37_p5, %s1070_s24, %s39_s10  }
  0x15   : > { %227 = sbr.rel (!%p48_p3) target bundleno = 32 (0x20), region = 28  ;;  %s229_s12 = sand.u32 (%p48_p3), 1, %s1070_s24  }
  0x16   : > { %s911_s13 = sshll.u32 (%p48_p3), %s1086_s28, 4  ;;  %s879_s14 = sshll.u32 (%p48_p3), %s229_s12, 5 }
  0x17   : > { %s234_s15 = sadd.s32 (%p48_p3), %s1082_s27, %s911_s13  ;;  %s231_s20 = scalar_lea.vmem (%p48_p3), [#allocation4], %s879_s14 }
  0x18   : > { %s882_s16 = sshll.u32 (%p48_p3), %s234_s15, 2 }
  0x19   : > { %s236_s19 = scalar_lea.vmem (%p48_p3), %s1305_s0, %s882_s16 }
  0x1a   : > { %v252_v1 = vld [vmem:[%s236_s19] sm:$0xf] (%p48_p3)  ;;  %v254_v2 = vld [vmem:[%s236_s19 + $0x8] sm:$0xf] (%p48_p3)  ;;  %v256_v3 = vld [vmem:[%s236_s19 + $0x10] sm:$0xf] (%p48_p3) }
  0x1b   : > { %253 = vst [vmem:[%s231_s20] sm:$0xf] (%p48_p3), %v252_v1  ;;  %255 = vst [vmem:[%s231_s20 + $0x4] sm:$0xf] (%p48_p3), %v254_v2  ;;  %v258_v4 = vld [vmem:[%s236_s19 + $0x18] sm:$0xf] (%p48_p3) }
  0x1c   : > { %257 = vst [vmem:[%s231_s20 + $0x8] sm:$0xf] %v256_v3  ;;  %v260_v5 = vld [vmem:[%s236_s19 + $0x20] sm:$0xf]  ;;  %v262_v6 = vld [vmem:[%s236_s19 + $0x28] sm:$0xf] }
  0x1d   : > { %259 = vst [vmem:[%s231_s20 + $0xc] sm:$0xf] %v258_v4  ;;  %261 = vst [vmem:[%s231_s20 + $0x10] sm:$0xf] %v260_v5  ;;  %v264_v7 = vld [vmem:[%s236_s19 + $0x30] sm:$0xf] }
  0x1e   : > { %263 = vst [vmem:[%s231_s20 + $0x14] sm:$0xf] %v262_v6  ;;  %v266_v8 = vld [vmem:[%s236_s19 + $0x38] sm:$0xf]  ;;  %265 = vst [vmem:[%s231_s20 + $0x18] sm:$0xf] %v264_v7 }
  0x1f   : > { %267 = vst [vmem:[%s231_s20 + $0x1c] sm:$0xf] %v266_v8 }
  0x20 PF: > { %p883_p7 = scmp.ge.s32.totalorder %s1090_s29, 1  ;;  %p332_p8 = scmp.lt.s32.totalorder %s1090_s29, 9 }
  0x22   : > { %p333_p9 = pnand %p883_p7, %p332_p8 }
  0x23   : > { %s339_s21 = sand.u32 (!%p333_p9), 1, %s1066_s23   ;;  %s885_s22 = sshll.u32 (!%p333_p9), %s1074_s25, 4 }
  0x24   : > { %336 = sbr.rel (%p333_p9) target bundleno = 480 (0x1e0), region = 81  ;;  %s884_s7 = sshll.u32 (!%p333_p9), %s339_s21, 5 }
  0x25   : > { %p385_p10 = scmp.lt.s32.totalorder (!%p333_p9), %s885_s22, 31  ;;  %s887_s8 = sshll.u32 (!%p333_p9), %s1078_s26, 3 }
  0x26   : > { %p391_p11 = scmp.lt.s32.totalorder (!%p333_p9), %s887_s8, 31  ;;  %p893_p12 = scmp.ne.s32.totalorder (!%p333_p9), %s1074_s25, 0 }
  0x2b   : > { %s1325_s22 = smov (!%p385_p10, %s885_s22), 31  ;;  %s1327_s8 = smov (!%p391_p11, %s887_s8), 31 }
  0x2c   : > { %s886_s9 = sshll.u32 %s1325_s22, 2  ;;  %s888_s14 = sshll.u32 %s1327_s8, 3  ;;  %vm413_vm0 = vcmask (!%p893_p12), 261120   ;;  %v1092_v9 = vmov (!%p893_p12), 0.0  }
  0x2d   : > { %s1200_s13 = scalar_lea.vmem %s1306_s1, %s886_s9  ;;  %s1205_s17 = scalar_lea.vmem %s1307_s2, %s888_s14  ;;  %414 = vst.msk [vmem:[#allocation2] sm:$0xff] (!%p893_p12), %vm413_vm0, %v1092_v9  ;;  %415 = vst.msk [vmem:[#allocation2 + $0x8] sm:$0xff] (!%p893_p12), %vm413_vm0, %v1092_v9 }
  0x2e   : > { %s1210_s19 = scalar_lea.vmem %s1308_s3, %s888_s14  ;;  %s1215_s21 = scalar_lea.vmem %s1311_s6, %s888_s14  ;;  %416 = vst.msk [vmem:[#allocation2 + $0x10] sm:$0xff] (!%p893_p12), %vm413_vm0, %v1092_v9  ;;  %417 = vst.msk [vmem:[#allocation2 + $0x18] sm:$0xff] (!%p893_p12), %vm413_vm0, %v1092_v9 }
  0x2f   : > { %s1217_s22 = scalar_lea.vmem [#allocation4], %s884_s7  ;;  %412 = sbr.rel (%p893_p12) target bundleno = 54 (0x36), region = 89  ;;  %418 = vst.msk [vmem:[#allocation2 + $0x20] sm:$0xff] (!%p893_p12), %vm413_vm0, %v1092_v9  ;;  %419 = vst.msk [vmem:[#allocation2 + $0x28] sm:$0xff] (!%p893_p12), %vm413_vm0, %v1092_v9 }
  0x30   : > { %420 = vst.msk [vmem:[#allocation2 + $0x30] sm:$0xff] (!%p893_p12), %vm413_vm0, %v1092_v9  ;;  %421 = vst.msk [vmem:[#allocation2 + $0x38] sm:$0xff] (!%p893_p12), %vm413_vm0, %v1092_v9 }
  0x36 PF: > { %v1022_v10 = vld [vmem:[%s1200_s13] sm:$0xff]   ;;  %v1023_v11 = vld [vmem:[%s1200_s13 + $0x8] sm:$0xff]   ;;  %v1024_v12 = vld [vmem:[%s1200_s13 + $0x10] sm:$0xff]   ;;  %vm599_vm1 = vcmask 261120   ;;  %p906_p13 = scmp.ne.s32.totalorder %s1074_s25, 1 }
  0x37   : > { %924 = vmatprep.subr.bf16.mxu0 %v1022_v10  ;;  %948 = vmatprep.subr.bf16.mxu1 %v1022_v10  ;;  %v1025_v13 = vld [vmem:[%s1200_s13 + $0x18] sm:$0xff]   ;;  %v1031_v15 = vld [vmem:[%s1217_s22 + $0x10] sm:$0xff]   ;;  %v1028_v18 = vld [vmem:[%s1200_s13 + $0x30] sm:$0xff]   ;;  %v1093_v48 = vmov (!%p906_p13), 0   ;;  %vm754_vm2 = vcmask (!%p906_p13), 7168  }
  0x38   : > { %925 = vmatpush3.bf16.msra.mxu0 %v1022_v10  ;;  %956 = vmatpush3.bf16.msra.mxu1 %v1022_v10  ;;  %v1030_v14 = vld [vmem:[%s1217_s22] sm:$0xff]   ;;  %v1026_v16 = vld [vmem:[%s1200_s13 + $0x20] sm:$0xff]   ;;  %v1027_v17 = vld [vmem:[%s1200_s13 + $0x28] sm:$0xff]  }
  0x39   : > { %926 = vmatprep.subr.bf16.mxu0 %v1023_v11  ;;  %949 = vmatprep.subr.bf16.mxu1 %v1023_v11  ;;  %v1029_v19 = vld [vmem:[%s1200_s13 + $0x38] sm:$0xff]   ;;  %v1033_v21 = vld [vmem:[%s1217_s22 + $0x18] sm:$0xff]   ;;  %v424_v22 = vld [vmem:[#allocation2 + $0x10] sm:$0xff] }
  0x3a   : > { %940 = vmatprep.mubr.bf16.mxu0 %v1030_v14  ;;  %944 = vmatprep.mubr.bf16.mxu1 %v1031_v15  ;;  %v1032_v20 = vld [vmem:[%s1217_s22 + $0x8] sm:$0xff]   ;;  %v422_v24 = vld [vmem:[#allocation2] sm:$0xff]  ;;  %v425_v28 = vld [vmem:[#allocation2 + $0x18] sm:$0xff] }
  0x3b   : > { %v428_v23 = vld [vmem:[#allocation2 + $0x30] sm:$0xff]  ;;  %v426_v25 = vld [vmem:[#allocation2 + $0x20] sm:$0xff]  ;;  %v429_v29 = vld [vmem:[#allocation2 + $0x38] sm:$0xff]  ;;  %1035 = vset.pattern.permute.xlu1 (!%p906_p13), %v1093_v48  ;;  %1034 = vset.pattern.permute.xlu0 (!%p906_p13), %v1093_v48 }
  0x3c   : > { %927 = vmatpush3.bf16.msra.mxu0 %v1023_v11  ;;  %957 = vmatpush3.bf16.msra.mxu1 %v1023_v11  ;;  %v423_v34 = vld [vmem:[#allocation2 + $0x8] sm:$0xff]  ;;  %v622_v46 = vld [vmem:[%s1205_s17 + $0x10] sm:$0xff] (!%p906_p13)  ;;  %v620_v47 = vld [vmem:[%s1205_s17] sm:$0xff] (!%p906_p13) }
  0x3d   : > { %928 = vmatprep.subr.bf16.mxu0 %v1024_v12  ;;  %950 = vmatprep.subr.bf16.mxu1 %v1024_v12  ;;  %v427_v35 = vld [vmem:[#allocation2 + $0x28] sm:$0xff]  ;;  %v621_v50 = vld [vmem:[%s1205_s17 + $0x8] sm:$0xff] (!%p906_p13)  ;;  %v624_v52 = vld [vmem:[%s1205_s17 + $0x20] sm:$0xff] (!%p906_p13) }
  0x3e   : > { %640 = vperm.xlu1 (!%p906_p13), %1035, %v622_v46   ;;  %630 = vperm.xlu0 (!%p906_p13), %1034, %v620_v47   ;;  %v623_v49 = vld [vmem:[%s1205_s17 + $0x18] sm:$0xff] (!%p906_p13)  ;;  %v625_v51 = vld [vmem:[%s1205_s17 + $0x28] sm:$0xff] (!%p906_p13)  ;;  %v626_v54 = vld [vmem:[%s1205_s17 + $0x30] sm:$0xff] (!%p906_p13) }
  0x3f   : > { %v627_v53 = vld [vmem:[%s1205_s17 + $0x38] sm:$0xff] (!%p906_p13)  ;;  %v678_v57 = vld [vmem:[%s1210_s19 + $0x10] sm:$0xff] (!%p906_p13)  ;;  %v676_v59 = vld [vmem:[%s1210_s19] sm:$0xff] (!%p906_p13) }
  0x40   : > { %929 = vmatpush3.bf16.msra.mxu0 %v1024_v12  ;;  %958 = vmatpush3.bf16.msra.mxu1 %v1024_v12  ;;  %v679_v3 = vld [vmem:[%s1210_s19 + $0x18] sm:$0xff] (!%p906_p13)  ;;  %v677_v5 = vld [vmem:[%s1210_s19 + $0x8] sm:$0xff] (!%p906_p13)  ;;  %v907_v7 = vld [vmem:[%s1309_s4] ss:$0 sm:$0xff] (!%p906_p13) }
  0x41   : > { %930 = vmatprep.subr.bf16.mxu0 %v1025_v13  ;;  %951 = vmatprep.subr.bf16.mxu1 %v1025_v13 }
  0x42   : > { %645 = vperm.xlu1 (!%p906_p13), %1035, %v623_v49   ;;  %635 = vperm.xlu0 (!%p906_p13), %1034, %v621_v50  }
  0x44   : > { %931 = vmatpush3.bf16.msra.mxu0 %v1025_v13  ;;  %959 = vmatpush3.bf16.msra.mxu1 %v1025_v13 }
  0x45   : > { %932 = vmatprep.subr.bf16.mxu0 %v1026_v16  ;;  %952 = vmatprep.subr.bf16.mxu1 %v1026_v16 }
  0x46   : > { %655 = vperm.xlu1 (!%p906_p13), %1035, %v625_v51   ;;  %650 = vperm.xlu0 (!%p906_p13), %1034, %v624_v52  }
  0x48   : > { %933 = vmatpush3.bf16.msra.mxu0 %v1026_v16  ;;  %960 = vmatpush3.bf16.msra.mxu1 %v1026_v16 }
  0x49   : > { %934 = vmatprep.subr.bf16.mxu0 %v1027_v17  ;;  %953 = vmatprep.subr.bf16.mxu1 %v1027_v17 }
  0x4a   : > { %665 = vperm.xlu1 (!%p906_p13), %1035, %v627_v53   ;;  %660 = vperm.xlu0 (!%p906_p13), %1034, %v626_v54  }
  0x4c   : > { %935 = vmatpush3.bf16.msra.mxu0 %v1027_v17  ;;  %961 = vmatpush3.bf16.msra.mxu1 %v1027_v17 }
  0x4d   : > { %936 = vmatprep.subr.bf16.mxu0 %v1028_v18  ;;  %954 = vmatprep.subr.bf16.mxu1 %v1028_v18 }
  0x50   : > { %937 = vmatpush3.bf16.msra.mxu0 %v1028_v18  ;;  %962 = vmatpush3.bf16.msra.mxu1 %v1028_v18  ;;  %v681_v18 = vld [vmem:[%s1210_s19 + $0x28] sm:$0xff] (!%p906_p13) }
  0x51   : > { %938 = vmatprep.subr.bf16.mxu0 %v1029_v19  ;;  %955 = vmatprep.subr.bf16.mxu1 %v1029_v19 }
  0x54   : > { %939 = vmatpush3.bf16.msra.mxu0 %v1029_v19  ;;  %963 = vmatpush3.bf16.msra.mxu1 %v1029_v19 }
  0x57   : > { %941 = vmatmul.mubr.bf16.vlgmr.msra.gmra.mrb[0].mxu0 %v1032_v20  ;;  %945 = vmatmul.mubr.bf16.vlgmr.msra.gmra.mrb[0].mxu1 %v1033_v21  ;;  %v680_v20 = vld [vmem:[%s1210_s19 + $0x20] sm:$0xff] (!%p906_p13) }
  0xbd   : > { %v641_v58 = vpop.permute.xlu1 (!%p906_p13), %640  ;;  %v631_v60 = vpop.permute.xlu0 (!%p906_p13), %630 }
  0xc1   : > { %v646_v4 = vpop.permute.xlu1 (!%p906_p13), %645  ;;  %v636_v6 = vpop.permute.xlu0 (!%p906_p13), %635 }
  0xc5   : > { %v656_v19 = vpop.permute.xlu1 (!%p906_p13), %655  ;;  %v651_v21 = vpop.permute.xlu0 (!%p906_p13), %650 }
 0x12a   : > { %v942_v26 = vpop.f32.mrb[0].mxu0  ;;  %v946_v27 = vpop.f32.mrb[0].mxu1  ;;  %611 = sbr.rel (%p906_p13) target bundleno = 480 (0x1e0), region = 93 }
 0x12b   : > { %v593_v30 = vadd.f32 %v942_v26, %v424_v22  ;;  %v597_v31 = vadd.f32 %v946_v27, %v428_v23  ;;  %v560_v32 = vpop.f32.mrb[1].mxu0  ;;  %v576_v33 = vpop.f32.mrb[1].mxu1 }
 0x12c   : > { %v591_v36 = vadd.f32 %v560_v32, %v422_v24  ;;  %v595_v37 = vadd.f32 %v576_v33, %v426_v25  ;;  %v943_v38 = vpop.f32.mrb[2].mxu0  ;;  %v947_v39 = vpop.f32.mrb[2].mxu1  ;;  %v683_v33 = vld [vmem:[%s1210_s19 + $0x38] sm:$0xff] (!%p906_p13) }
 0x12d   : > { %602 = vst.msk [vmem:[#allocation2 + $0x10] sm:$0xff] %vm599_vm1, %v593_v30  ;;  %606 = vst.msk [vmem:[#allocation2 + $0x30] sm:$0xff] %vm599_vm1, %v597_v31  ;;  %v594_v40 = vadd.f32 %v943_v38, %v425_v28  ;;  %v598_v41 = vadd.f32 %v947_v39, %v429_v29  ;;  %v563_v42 = vpop.f32.mrb[3].mxu0  ;;  %v579_v43 = vpop.f32.mrb[3].mxu1 }
 0x12e   : > { %600 = vst.msk [vmem:[#allocation2] sm:$0xff] %vm599_vm1, %v591_v36  ;;  %604 = vst.msk [vmem:[#allocation2 + $0x20] sm:$0xff] %vm599_vm1, %v595_v37  ;;  %v592_v44 = vadd.f32 %v563_v42, %v423_v34  ;;  %v596_v45 = vadd.f32 %v579_v43, %v427_v35  ;;  %v666_v34 = vpop.permute.xlu1 (!%p906_p13), %665  ;;  %v682_v35 = vld [vmem:[%s1210_s19 + $0x30] sm:$0xff] (!%p906_p13)  ;;  %v661_v36 = vpop.permute.xlu0 (!%p906_p13), %660 }
 0x12f   : > { %603 = vst.msk [vmem:[#allocation2 + $0x18] sm:$0xff] %vm599_vm1, %v594_v40  ;;  %607 = vst.msk [vmem:[#allocation2 + $0x38] sm:$0xff] %vm599_vm1, %v598_v41 }
 0x130   : > { %601 = vst.msk [vmem:[#allocation2 + $0x8] sm:$0xff] %vm599_vm1, %v592_v44  ;;  %605 = vst.msk [vmem:[#allocation2 + $0x28] sm:$0xff] %vm599_vm1, %v596_v45 }
 0x134   : > { %v614_v55 = vld [vmem:[#allocation2 + $0x10] sm:$0xff] }
 0x135   : > { %v612_v56 = vld [vmem:[#allocation2] sm:$0xff]  ;;  %v670_v61 = vmul.f32 %v641_v58, %v614_v55  ;;  %v618_v27 = vld [vmem:[#allocation2 + $0x30] sm:$0xff] }
 0x136   : > { %v668_v62 = vmul.f32 %v631_v60, %v612_v56  ;;  %v615_v63 = vld [vmem:[#allocation2 + $0x18] sm:$0xff]  ;;  %v616_v13 = vld [vmem:[#allocation2 + $0x20] sm:$0xff]  ;;  %v674_v39 = vmul.f32 %v661_v36, %v618_v27 }
 0x137   : > { %v613_v0 = vld [vmem:[#allocation2 + $0x8] sm:$0xff]  ;;  %v686_v1 = vadd.f32 %v678_v57, %v670_v61  ;;  %v671_v8 = vmul.f32 %v646_v4, %v615_v63  ;;  %v672_v23 = vmul.f32 %v651_v21, %v616_v13  ;;  %v619_v26 = vld [vmem:[#allocation2 + $0x38] sm:$0xff]  ;;  %v908_v56 = vld [vmem:[#allocation3] ss:$0 sm:$0xff] }
 0x138   : > { %v684_v2 = vadd.f32 %v676_v59, %v668_v62  ;;  %v669_v9 = vmul.f32 %v636_v6, %v613_v0  ;;  %v617_v12 = vld [vmem:[#allocation2 + $0x28] sm:$0xff]  ;;  %v675_v38 = vmul.f32 %v666_v34, %v619_v26  ;;  %v690_v44 = vadd.f32 %v682_v35, %v674_v39 }
 0x139   : > { %v694_v11 = vmax.f32 %v686_v1, 0.0  ;;  %v687_v14 = vadd.f32 %v679_v3, %v671_v8  ;;  %v673_v22 = vmul.f32 %v656_v19, %v617_v12  ;;  %v688_v30 = vadd.f32 %v680_v20, %v672_v23 }
 0x13a   : > { %v692_v10 = vmax.f32 %v684_v2, 0.0  ;;  %v685_v15 = vadd.f32 %v677_v5, %v669_v9  ;;  %v691_v43 = vadd.f32 %v683_v33, %v675_v38  ;;  %v698_v48 = vmax.f32 %v690_v44, 0.0 }
 0x13b   : > { %v709_v17 = vmul.f32 %v907_v7, %v694_v11  ;;  %v695_v28 = vmax.f32 %v687_v14, 0.0  ;;  %v689_v29 = vadd.f32 %v681_v18, %v673_v22  ;;  %v696_v41 = vmax.f32 %v688_v30, 0.0 }
 0x13c   : > { %v707_v16 = vmul.f32 %v907_v7, %v692_v10  ;;  %v693_v25 = vmax.f32 %v685_v15, 0.0  ;;  %v699_v50 = vmax.f32 %v691_v43, 0.0  ;;  %v713_v51 = vmul.f32 %v907_v7, %v698_v48 }
 0x13d   : > { %v721_v32 = vsel %vm599_vm1, %v709_v17, 0.0  ;;  %v710_v37 = vmul.f32 %v907_v7, %v695_v28  ;;  %v697_v42 = vmax.f32 %v689_v29, 0.0  ;;  %v711_v45 = vmul.f32 %v907_v7, %v696_v41 }
 0x13e   : > { %v715_v24 = vsel %vm599_vm1, %v707_v16, 0.0  ;;  %v708_v31 = vmul.f32 %v907_v7, %v693_v25  ;;  %v733_v52 = vsel %vm599_vm1, %v713_v51, 0.0  ;;  %v714_v54 = vmul.f32 %v907_v7, %v699_v50 }
 0x13f   : > { %716 = vadd.xlane.f32.xlu0 %v715_v24  ;;  %v724_v46 = vsel %vm599_vm1, %v710_v37, 0.0  ;;  %v727_v47 = vsel %vm599_vm1, %v711_v45, 0.0  ;;  %v712_v49 = vmul.f32 %v907_v7, %v697_v42 }
 0x140   : > { %v718_v40 = vsel %vm599_vm1, %v708_v31, 0.0  ;;  %v736_v55 = vsel %vm599_vm1, %v714_v54, 0.0 }
 0x141   : > { %719 = vadd.xlane.f32.xlu1 %v718_v40  ;;  %v730_v53 = vsel %vm599_vm1, %v712_v49, 0.0 }
 0x143   : > { %722 = vadd.xlane.f32.xlu0 %v721_v32 }
 0x145   : > { %728 = vadd.xlane.f32.xlu1 %v727_v47 }
 0x147   : > { %725 = vadd.xlane.f32.xlu0 %v724_v46 }
 0x149   : > { %734 = vadd.xlane.f32.xlu1 %v733_v52 }
 0x14b   : > { %731 = vadd.xlane.f32.xlu0 %v730_v53 }
 0x14f   : > { %737 = vadd.xlane.f32.xlu0 %v736_v55 }
 0x1cc   : > { %v717_v57 = vpop.xlane.xlu0 %716 }
 0x1cd   : > { %v746_v58 = vadd.f32 %v908_v56, %v717_v57 }
 0x1ce   : > { %v720_v59 = vpop.xlane.xlu1 %719 }
 0x1cf   : > { %755 = vst.msk [vmem:[%s1215_s21] sm:$0xff] %vm754_vm2, %v746_v58  ;;  %v747_v61 = vadd.f32 %v908_v56, %v720_v59 }
 0x1d0   : > { %v723_v60 = vpop.xlane.xlu0 %722 }
 0x1d1   : > { %v748_v62 = vadd.f32 %v908_v56, %v723_v60  ;;  %756 = vst.msk [vmem:[%s1215_s21 + $0x8] sm:$0xff] %vm754_vm2, %v747_v61 }
 0x1d2   : > { %v729_v63 = vpop.xlane.xlu1 %728 }
 0x1d3   : > { %757 = vst.msk [vmem:[%s1215_s21 + $0x10] sm:$0xff] %vm754_vm2, %v748_v62  ;;  %v750_v1 = vadd.f32 %v908_v56, %v729_v63 }
 0x1d4   : > { %v726_v0 = vpop.xlane.xlu0 %725 }
 0x1d5   : > { %v749_v2 = vadd.f32 %v908_v56, %v726_v0  ;;  %759 = vst.msk [vmem:[%s1215_s21 + $0x20] sm:$0xff] %vm754_vm2, %v750_v1 }
 0x1d6   : > { %v735_v3 = vpop.xlane.xlu1 %734 }
 0x1d7   : > { %758 = vst.msk [vmem:[%s1215_s21 + $0x18] sm:$0xff] %vm754_vm2, %v749_v2  ;;  %v752_v5 = vadd.f32 %v908_v56, %v735_v3 }
 0x1d8   : > { %v732_v4 = vpop.xlane.xlu0 %731 }
 0x1d9   : > { %v751_v6 = vadd.f32 %v908_v56, %v732_v4  ;;  %761 = vst.msk [vmem:[%s1215_s21 + $0x30] sm:$0xff] %vm754_vm2, %v752_v5 }
 0x1db   : > { %760 = vst.msk [vmem:[%s1215_s21 + $0x28] sm:$0xff] %vm754_vm2, %v751_v6 }
 0x1dc   : > { %v738_v7 = vpop.xlane.xlu0 %737 }
 0x1dd   : > { %v753_v8 = vadd.f32 %v908_v56, %v738_v7 }
 0x1df   : > { %762 = vst.msk [vmem:[%s1215_s21 + $0x38] sm:$0xff] %vm754_vm2, %v753_v8 }
 0x1e0 PF: > { %s18_s29 = sadd.s32 1, %s1090_s29   ;;  %s1312_s23 = smov %s1070_s24 }
 0x1e1   : > { %p15_p0 = scmp.ge.s32.totalorder %s18_s29, 10   ;;  %s1313_s24 = smov %s1183_s11 }
 0x1e2   : > { %s1314_s25 = smov %s1082_s27  ;;  %s1315_s26 = smov %s1086_s28 }
 0x1e3   : > { %s1316_s27 = smov %s1319_s5  ;;  %s1317_s28 = smov %s1323_s30 }
 0x1e4   :  { %17 = sbr.rel (!%p15_p0) target bundleno = 7 (0x7), region = 137 }

// kernel: diffusion_gnn_forward.2
= control target key start
LH: loop header
LB: loop body
LE: loop exit
PB: predicated region body
PF: predicated region fallthrough
CT: control target
= control target key end

     0   :  { %s1685_s0 = inlined_call_operand.vmem [shape: bf16[256,256], index: 0, kind: input, shape index: {}]   ;;  %s1686_s1 = inlined_call_operand.vmem [shape: bf16[256,32], index: 1, kind: input, shape index: {}]   ;;  %s1687_s2 = inlined_call_operand.vmem [shape: f32[256,1], index: 2, kind: input, shape index: {}]   ;;  %s1688_s3 = inlined_call_operand.vmem [shape: f32[256,32], index: 3, kind: input, shape index: {}]   ;;  %s1689_s4 = inlined_call_operand.vmem [shape: bf16[32,32], index: 4, kind: input, shape index: {}]   ;;  %s1690_s5 = inlined_call_operand.vmem [shape: bf16[32,32], index: 5, kind: input, shape index: {}]   ;;  %s1691_s6 = inlined_call_operand.vmem [shape: f32[1,32], index: 6, kind: input, shape index: {}]   ;;  %s1692_s7 = inlined_call_operand.vmem [shape: bf16[256,32], index: 7, kind: output, shape index: {0}]   ;;  %s1693_s8 = inlined_call_operand.vmem [shape: f32[256,32], index: 8, kind: output, shape index: {1}]  }
   0x1   :  { %1696 = sst [smem:[#allocation6_spill]] %s1685_s0 }
   0x2   :  { %s1479_s27 = smov 0   ;;  %s1481_s28 = smov 0  }
   0x3   :  { %s1483_s29 = smov 0   ;;  %s1485_s30 = smov 0  }
   0x4   :  { %s1487_s9 = smov 0   ;;  %s1489_s10 = smov 0  }
   0x5   :  { %s1491_s11 = smov 0  }
   0x6 LB: > { %s28_s12 = sadd.s32 1, %s1422_s9  ;;  %s31_s13 = sadd.s32 1, %s1426_s10  ;;  %s1430_s11 = sphi %s1491_s11, %s19_s11   ;;  %s1426_s10 = sphi %s1489_s10, %s1707_s10   ;;  %s1422_s9 = sphi %s1487_s9, %s1706_s9   ;;  %s1418_s30 = sphi %s1485_s30, %s1705_s30   ;;  %s1414_s29 = sphi %s1483_s29, %s1704_s29   ;;  %s1410_s28 = sphi %s1481_s28, %s1703_s28   ;;  %s1406_s27 = sphi %s1479_s27, %s1702_s27  }
   0x7   : > { %p29_p0 = scmp.ge.s32.totalorder %s28_s12, 2  ;;  %p47_p1 = scmp.ne.s32.totalorder %s1410_s28, %s1406_s27 }
   0x8   : > { %p48_p2 = scmp.eq.s32.totalorder %s1430_s11, 0  ;;  %s40_s17 = sadd.s32 1, %s1410_s28 }
   0x9   : > { %s1709_s12 = smov (%p29_p0, %s28_s12), 0  ;;  %s1711_s13 = smov (!%p29_p0, %s31_s13), %s1426_s10 }
   0xa   : > { %1697 = sst [smem:[#allocation4_spill]] %s1709_s12  ;;  %p49_p3 = por %p48_p2, %p47_p1 }
   0xb   : > { %p33_p4 = scmp.ge.s32.totalorder %s1711_s13, 4  ;;  %s36_s14 = ssub.s32 %s1422_s9, %s1709_s12 }
   0xc   : > { %p1149_p6 = scmp.ge.s32.totalorder %s1430_s11, 8 }
   0xd   : > { %s1713_s13 = smov (%p33_p4, %s1711_s13), 0 }
   0xe   : > { %1698 = sst [smem:[#allocation5_spill]] %s1713_s13  ;;  %s35_s15 = ssub.s32 %s1426_s10, %s1713_s13 }
   0xf   : > { %s37_s16 = sor.u32 %s36_s14, %s35_s15  ;;  %275 = sbr.rel (%p1149_p6) target bundleno = 37 (0x25), region = 28 }
  0x10   : > { %p38_p5 = scmp.eq.s32.totalorder %s37_s16, 0 }
  0x12   : > { %s1530_s18 = scalar_select %p38_p5, %s1410_s28, %s40_s17  }
  0x16   : > { %278 = sbr.rel (!%p49_p3) target bundleno = 37 (0x25), region = 32  ;;  %s280_s19 = sand.u32 (%p49_p3), 1, %s1410_s28  }
  0x17   : > { %s1203_s20 = sshll.u32 (%p49_p3), %s1426_s10, 4  ;;  %s1150_s21 = sshll.u32 (%p49_p3), %s280_s19, 5 }
  0x18   : > { %s285_s22 = sadd.s32 (%p49_p3), %s1422_s9, %s1203_s20  ;;  %s1699_s0 = sld [smem:[#allocation6_spill]] (%p49_p3) }
  0x19   : > { %s1153_s23 = sshll.u32 (%p49_p3), %s285_s22, 2  ;;  %s282_s14 = scalar_lea.vmem (%p49_p3), [#allocation3], %s1150_s21 }
  0x1e   : > { %s287_s26 = scalar_lea.vmem %s1699_s0, %s1153_s23 }
  0x1f   : > { %v303_v0 = vld [vmem:[%s287_s26] sm:$0xf]  ;;  %v305_v1 = vld [vmem:[%s287_s26 + $0x8] sm:$0xf]  ;;  %v307_v2 = vld [vmem:[%s287_s26 + $0x10] sm:$0xf] }
  0x20   : > { %304 = vst [vmem:[%s282_s14] sm:$0xf] %v303_v0  ;;  %306 = vst [vmem:[%s282_s14 + $0x4] sm:$0xf] %v305_v1  ;;  %v309_v3 = vld [vmem:[%s287_s26 + $0x18] sm:$0xf] }
  0x21   : > { %308 = vst [vmem:[%s282_s14 + $0x8] sm:$0xf] %v307_v2  ;;  %v311_v4 = vld [vmem:[%s287_s26 + $0x20] sm:$0xf]  ;;  %v313_v5 = vld [vmem:[%s287_s26 + $0x28] sm:$0xf] }
  0x22   : > { %310 = vst [vmem:[%s282_s14 + $0xc] sm:$0xf] %v309_v3  ;;  %312 = vst [vmem:[%s282_s14 + $0x10] sm:$0xf] %v311_v4  ;;  %v315_v6 = vld [vmem:[%s287_s26 + $0x30] sm:$0xf] }
  0x23   : > { %314 = vst [vmem:[%s282_s14 + $0x14] sm:$0xf] %v313_v5  ;;  %v317_v7 = vld [vmem:[%s287_s26 + $0x38] sm:$0xf]  ;;  %316 = vst [vmem:[%s282_s14 + $0x18] sm:$0xf] %v315_v6 }
  0x24   : > { %318 = vst [vmem:[%s282_s14 + $0x1c] sm:$0xf] %v317_v7 }
  0x25 PF: > { %p1154_p7 = scmp.ge.s32.totalorder %s1430_s11, 1  ;;  %p383_p8 = scmp.lt.s32.totalorder %s1430_s11, 9 }
  0x27   : > { %p384_p9 = pnand %p1154_p7, %p383_p8 }
  0x28   : > { %s390_s15 = sand.u32 (!%p384_p9), 1, %s1406_s27   ;;  %s1156_s16 = sshll.u32 (!%p384_p9), %s1414_s29, 4 }
  0x29   : > { %387 = sbr.rel (%p384_p9) target bundleno = 554 (0x22a), region = 85  ;;  %s1155_s17 = sshll.u32 (!%p384_p9), %s390_s15, 5 }
  0x2a   : > { %p445_p10 = scmp.lt.s32.totalorder (!%p384_p9), %s1156_s16, 31  ;;  %s1158_s19 = sshll.u32 (!%p384_p9), %s1418_s30, 3 }
  0x2b   : > { %p451_p11 = scmp.lt.s32.totalorder (!%p384_p9), %s1158_s19, 31  ;;  %p1166_p12 = scmp.ne.s32.totalorder (!%p384_p9), %s1414_s29, 0 }
  0x30   : > { %s1715_s16 = smov (!%p445_p10, %s1156_s16), 31  ;;  %s1717_s19 = smov (!%p451_p11, %s1158_s19), 31 }
  0x31   : > { %s1157_s20 = sshll.u32 %s1715_s16, 2  ;;  %s1159_s24 = sshll.u32 %s1717_s19, 3  ;;  %vm479_vm0 = vcmask (!%p1166_p12), 261120   ;;  %v1432_v8 = vmov (!%p1166_p12), 0.0  }
  0x32   : > { %s1547_s23 = scalar_lea.vmem %s1686_s1, %s1157_s20  ;;  %s1163_s25 = sshll.u32 %s1717_s19, 2  ;;  %480 = vst.msk [vmem:[#allocation2] sm:$0xff] (!%p1166_p12), %vm479_vm0, %v1432_v8  ;;  %481 = vst.msk [vmem:[#allocation2 + $0x8] sm:$0xff] (!%p1166_p12), %vm479_vm0, %v1432_v8 }
  0x33   : > { %s1552_s0 = scalar_lea.vmem %s1687_s2, %s1159_s24  ;;  %s1557_s30 = scalar_lea.vmem %s1688_s3, %s1159_s24  ;;  %482 = vst.msk [vmem:[#allocation2 + $0x10] sm:$0xff] (!%p1166_p12), %vm479_vm0, %v1432_v8  ;;  %483 = vst.msk [vmem:[#allocation2 + $0x18] sm:$0xff] (!%p1166_p12), %vm479_vm0, %v1432_v8 }
  0x34   : > { %s1562_s12 = scalar_lea.vmem %s1692_s7, %s1163_s25  ;;  %s1567_s22 = scalar_lea.vmem %s1693_s8, %s1159_s24  ;;  %484 = vst.msk [vmem:[#allocation2 + $0x20] sm:$0xff] (!%p1166_p12), %vm479_vm0, %v1432_v8  ;;  %485 = vst.msk [vmem:[#allocation2 + $0x28] sm:$0xff] (!%p1166_p12), %vm479_vm0, %v1432_v8 }
  0x35   : > { %s1569_s19 = scalar_lea.vmem [#allocation3], %s1155_s17  ;;  %478 = sbr.rel (%p1166_p12) target bundleno = 60 (0x3c), region = 93  ;;  %486 = vst.msk [vmem:[#allocation2 + $0x30] sm:$0xff] (!%p1166_p12), %vm479_vm0, %v1432_v8  ;;  %487 = vst.msk [vmem:[#allocation2 + $0x38] sm:$0xff] (!%p1166_p12), %vm479_vm0, %v1432_v8 }
  0x3c PF: > { %v1358_v9 = vld [vmem:[%s1547_s23] sm:$0xff]   ;;  %v1359_v10 = vld [vmem:[%s1547_s23 + $0x8] sm:$0xff]   ;;  %v1360_v11 = vld [vmem:[%s1547_s23 + $0x10] sm:$0xff]   ;;  %vm665_vm1 = vcmask 261120   ;;  %p1179_p13 = scmp.ne.s32.totalorder %s1414_s29, 1 }
  0x3d   : > { %1236 = vmatprep.subr.bf16.mxu0 %v1358_v9  ;;  %1284 = vmatprep.subr.bf16.mxu1 %v1358_v9  ;;  %v1361_v12 = vld [vmem:[%s1547_s23 + $0x18] sm:$0xff]   ;;  %v1366_v13 = vld [vmem:[%s1569_s19] sm:$0xff]   ;;  %v1367_v14 = vld [vmem:[%s1569_s19 + $0x10] sm:$0xff]   ;;  %v1433_v47 = vmov (!%p1179_p13), 0   ;;  %vm895_vm2 = vcmask (!%p1179_p13), 257024  }
  0x3e   : > { %1237 = vmatpush3.bf16.msra.mxu0 %v1358_v9  ;;  %1292 = vmatpush3.bf16.msra.mxu1 %v1358_v9  ;;  %v1362_v15 = vld [vmem:[%s1547_s23 + $0x20] sm:$0xff]   ;;  %v1363_v16 = vld [vmem:[%s1547_s23 + $0x28] sm:$0xff]   ;;  %v1364_v17 = vld [vmem:[%s1547_s23 + $0x30] sm:$0xff]  }
  0x3f   : > { %1238 = vmatprep.subr.bf16.mxu0 %v1359_v10  ;;  %1285 = vmatprep.subr.bf16.mxu1 %v1359_v10  ;;  %v1365_v18 = vld [vmem:[%s1547_s23 + $0x38] sm:$0xff]   ;;  %v1369_v20 = vld [vmem:[%s1569_s19 + $0x18] sm:$0xff]   ;;  %v490_v21 = vld [vmem:[#allocation2 + $0x10] sm:$0xff] }
  0x40   : > { %1252 = vmatprep.mubr.bf16.mxu0 %v1366_v13  ;;  %1256 = vmatprep.mubr.bf16.mxu1 %v1367_v14  ;;  %v1368_v19 = vld [vmem:[%s1569_s19 + $0x8] sm:$0xff]   ;;  %v494_v22 = vld [vmem:[#allocation2 + $0x30] sm:$0xff]  ;;  %v488_v23 = vld [vmem:[#allocation2] sm:$0xff] }
  0x41   : > { %v492_v24 = vld [vmem:[#allocation2 + $0x20] sm:$0xff]  ;;  %v491_v27 = vld [vmem:[#allocation2 + $0x18] sm:$0xff]  ;;  %v489_v33 = vld [vmem:[#allocation2 + $0x8] sm:$0xff]  ;;  %1371 = vset.pattern.permute.xlu1 (!%p1179_p13), %v1433_v47  ;;  %1370 = vset.pattern.permute.xlu0 (!%p1179_p13), %v1433_v47 }
  0x42   : > { %1239 = vmatpush3.bf16.msra.mxu0 %v1359_v10  ;;  %1293 = vmatpush3.bf16.msra.mxu1 %v1359_v10  ;;  %v495_v28 = vld [vmem:[#allocation2 + $0x38] sm:$0xff]  ;;  %v493_v34 = vld [vmem:[#allocation2 + $0x28] sm:$0xff]  ;;  %v688_v45 = vld [vmem:[%s1552_s0 + $0x10] sm:$0xff] (!%p1179_p13) }
  0x43   : > { %1240 = vmatprep.subr.bf16.mxu0 %v1360_v11  ;;  %1286 = vmatprep.subr.bf16.mxu1 %v1360_v11  ;;  %v686_v46 = vld [vmem:[%s1552_s0] sm:$0xff] (!%p1179_p13)  ;;  %v689_v48 = vld [vmem:[%s1552_s0 + $0x18] sm:$0xff] (!%p1179_p13)  ;;  %v687_v49 = vld [vmem:[%s1552_s0 + $0x8] sm:$0xff] (!%p1179_p13) }
  0x44   : > { %706 = vperm.xlu1 (!%p1179_p13), %1371, %v688_v45   ;;  %696 = vperm.xlu0 (!%p1179_p13), %1370, %v686_v46   ;;  %v1372_v50 = vld [vmem:[%s1689_s4] sm:$0xff] (!%p1179_p13)   ;;  %v691_v51 = vld [vmem:[%s1552_s0 + $0x28] sm:$0xff] (!%p1179_p13)  ;;  %v693_v56 = vld [vmem:[%s1552_s0 + $0x38] sm:$0xff] (!%p1179_p13) }
  0x45   : > { %v1373_v52 = vld [vmem:[%s1690_s5] sm:$0xff] (!%p1179_p13)   ;;  %v1374_v54 = vld [vmem:[%s1689_s4 + $0x8] sm:$0xff] (!%p1179_p13)   ;;  %v692_v57 = vld [vmem:[%s1552_s0 + $0x30] sm:$0xff] (!%p1179_p13) }
  0x46   : > { %1241 = vmatpush3.bf16.msra.mxu0 %v1360_v11  ;;  %1294 = vmatpush3.bf16.msra.mxu1 %v1360_v11  ;;  %v690_v53 = vld [vmem:[%s1552_s0 + $0x20] sm:$0xff] (!%p1179_p13)  ;;  %v1375_v55 = vld [vmem:[%s1690_s5 + $0x8] sm:$0xff] (!%p1179_p13)   ;;  %v744_v62 = vld [vmem:[%s1557_s30 + $0x10] sm:$0xff] (!%p1179_p13) }
  0x47   : > { %1242 = vmatprep.subr.bf16.mxu0 %v1361_v12  ;;  %1287 = vmatprep.subr.bf16.mxu1 %v1361_v12  ;;  %v742_v0 = vld [vmem:[%s1557_s30] sm:$0xff] (!%p1179_p13)  ;;  %v745_v6 = vld [vmem:[%s1557_s30 + $0x18] sm:$0xff] (!%p1179_p13)  ;;  %v743_v8 = vld [vmem:[%s1557_s30 + $0x8] sm:$0xff] (!%p1179_p13) }
  0x48   : > { %711 = vperm.xlu1 (!%p1179_p13), %1371, %v689_v48   ;;  %701 = vperm.xlu0 (!%p1179_p13), %1370, %v687_v49   ;;  %v1194_v46 = vld [vmem:[%s1691_s6] ss:$0 sm:$0xff] (!%p1179_p13) }
  0x4a   : > { %1243 = vmatpush3.bf16.msra.mxu0 %v1361_v12  ;;  %1295 = vmatpush3.bf16.msra.mxu1 %v1361_v12 }
  0x4b   : > { %1244 = vmatprep.subr.bf16.mxu0 %v1362_v15  ;;  %1288 = vmatprep.subr.bf16.mxu1 %v1362_v15 }
  0x4c   : > { %721 = vperm.xlu1 (!%p1179_p13), %1371, %v691_v51   ;;  %716 = vperm.xlu0 (!%p1179_p13), %1370, %v690_v53  }
  0x4e   : > { %1245 = vmatpush3.bf16.msra.mxu0 %v1362_v15  ;;  %1296 = vmatpush3.bf16.msra.mxu1 %v1362_v15 }
  0x4f   : > { %1246 = vmatprep.subr.bf16.mxu0 %v1363_v16  ;;  %1289 = vmatprep.subr.bf16.mxu1 %v1363_v16 }
  0x50   : > { %731 = vperm.xlu1 (!%p1179_p13), %1371, %v693_v56   ;;  %726 = vperm.xlu0 (!%p1179_p13), %1370, %v692_v57  }
  0x52   : > { %1247 = vmatpush3.bf16.msra.mxu0 %v1363_v16  ;;  %1297 = vmatpush3.bf16.msra.mxu1 %v1363_v16 }
  0x53   : > { %1248 = vmatprep.subr.bf16.mxu0 %v1364_v17  ;;  %1290 = vmatprep.subr.bf16.mxu1 %v1364_v17 }
  0x56   : > { %1249 = vmatpush3.bf16.msra.mxu0 %v1364_v17  ;;  %1298 = vmatpush3.bf16.msra.mxu1 %v1364_v17 }
  0x57   : > { %1250 = vmatprep.subr.bf16.mxu0 %v1365_v18  ;;  %1291 = vmatprep.subr.bf16.mxu1 %v1365_v18 }
  0x5a   : > { %1251 = vmatpush3.bf16.msra.mxu0 %v1365_v18  ;;  %1299 = vmatpush3.bf16.msra.mxu1 %v1365_v18  ;;  %v747_v18 = vld [vmem:[%s1557_s30 + $0x28] sm:$0xff] (!%p1179_p13) }
  0x5b   : > { %1260 = vmatprep.subr.bf16.mxu0 (!%p1179_p13), %v1372_v50  ;;  %1272 = vmatprep.subr.bf16.mxu1 (!%p1179_p13), %v1373_v52 }
  0x5d   : > { %1253 = vmatmul.mubr.bf16.vlgmr.msra.gmra.mrb[0].mxu0 %v1368_v19  ;;  %1257 = vmatmul.mubr.bf16.vlgmr.msra.gmra.mrb[0].mxu1 %v1369_v20  ;;  %v746_v20 = vld [vmem:[%s1557_s30 + $0x20] sm:$0xff] (!%p1179_p13) }
  0x5e   : > { %1261 = vmatpush3.bf16.msra.mxu0 (!%p1179_p13), %v1372_v50  ;;  %1273 = vmatpush3.bf16.msra.mxu1 (!%p1179_p13), %v1373_v52 }
  0x5f   : > { %1262 = vmatprep.subr.bf16.mxu0 (!%p1179_p13), %v1374_v54  ;;  %1274 = vmatprep.subr.bf16.mxu1 (!%p1179_p13), %v1375_v55 }
  0x62   : > { %1263 = vmatpush3.bf16.msra.mxu0 (!%p1179_p13), %v1374_v54  ;;  %1275 = vmatpush3.bf16.msra.mxu1 (!%p1179_p13), %v1375_v55 }
  0xc3   : > { %v707_v60 = vpop.permute.xlu1 (!%p1179_p13), %706  ;;  %v697_v61 = vpop.permute.xlu0 (!%p1179_p13), %696 }
  0xc7   : > { %v712_v7 = vpop.permute.xlu1 (!%p1179_p13), %711  ;;  %v702_v9 = vpop.permute.xlu0 (!%p1179_p13), %701 }
  0xcb   : > { %v722_v19 = vpop.permute.xlu1 (!%p1179_p13), %721 }
 0x130   : > { %v1254_v25 = vpop.f32.mrb[0].mxu0  ;;  %v1258_v26 = vpop.f32.mrb[0].mxu1  ;;  %677 = sbr.rel (%p1179_p13) target bundleno = 554 (0x22a), region = 97 }
 0x131   : > { %v659_v29 = vadd.f32 %v1254_v25, %v490_v21  ;;  %v663_v30 = vadd.f32 %v1258_v26, %v494_v22  ;;  %v626_v31 = vpop.f32.mrb[1].mxu0  ;;  %v642_v32 = vpop.f32.mrb[1].mxu1 }
 0x132   : > { %v657_v35 = vadd.f32 %v626_v31, %v488_v23  ;;  %v661_v36 = vadd.f32 %v642_v32, %v492_v24  ;;  %v1255_v37 = vpop.f32.mrb[2].mxu0  ;;  %v1259_v38 = vpop.f32.mrb[2].mxu1  ;;  %v749_v32 = vld [vmem:[%s1557_s30 + $0x38] sm:$0xff] (!%p1179_p13) }
 0x133   : > { %668 = vst.msk [vmem:[#allocation2 + $0x10] sm:$0xff] %vm665_vm1, %v659_v29  ;;  %672 = vst.msk [vmem:[#allocation2 + $0x30] sm:$0xff] %vm665_vm1, %v663_v30  ;;  %v660_v39 = vadd.f32 %v1255_v37, %v491_v27  ;;  %v664_v40 = vadd.f32 %v1259_v38, %v495_v28  ;;  %v629_v41 = vpop.f32.mrb[3].mxu0  ;;  %v645_v42 = vpop.f32.mrb[3].mxu1 }
 0x134   : > { %666 = vst.msk [vmem:[#allocation2] sm:$0xff] %vm665_vm1, %v657_v35  ;;  %670 = vst.msk [vmem:[#allocation2 + $0x20] sm:$0xff] %vm665_vm1, %v661_v36  ;;  %v658_v43 = vadd.f32 %v629_v41, %v489_v33  ;;  %v662_v44 = vadd.f32 %v645_v42, %v493_v34  ;;  %v717_v21 = vpop.permute.xlu0 (!%p1179_p13), %716  ;;  %v732_v33 = vpop.permute.xlu1 (!%p1179_p13), %731  ;;  %v748_v34 = vld [vmem:[%s1557_s30 + $0x30] sm:$0xff] (!%p1179_p13) }
 0x135   : > { %669 = vst.msk [vmem:[#allocation2 + $0x18] sm:$0xff] %vm665_vm1, %v660_v39  ;;  %673 = vst.msk [vmem:[#allocation2 + $0x38] sm:$0xff] %vm665_vm1, %v664_v40 }
 0x136   : > { %667 = vst.msk [vmem:[#allocation2 + $0x8] sm:$0xff] %vm665_vm1, %v658_v43  ;;  %671 = vst.msk [vmem:[#allocation2 + $0x28] sm:$0xff] %vm665_vm1, %v662_v44 }
 0x138   : > { %v727_v35 = vpop.permute.xlu0 %726 }
 0x13a   : > { %v680_v58 = vld [vmem:[#allocation2 + $0x10] sm:$0xff] }
 0x13b   : > { %v678_v59 = vld [vmem:[#allocation2] sm:$0xff]  ;;  %v736_v63 = vmul.f32 %v707_v60, %v680_v58  ;;  %v684_v27 = vld [vmem:[#allocation2 + $0x30] sm:$0xff] }
 0x13c   : > { %v734_v1 = vmul.f32 %v697_v61, %v678_v59  ;;  %v681_v2 = vld [vmem:[#allocation2 + $0x18] sm:$0xff]  ;;  %v682_v13 = vld [vmem:[#allocation2 + $0x20] sm:$0xff]  ;;  %v740_v39 = vmul.f32 %v727_v35, %v684_v27 }
 0x13d   : > { %v679_v3 = vld [vmem:[#allocation2 + $0x8] sm:$0xff]  ;;  %v752_v4 = vadd.f32 %v744_v62, %v736_v63  ;;  %v737_v10 = vmul.f32 %v712_v7, %v681_v2  ;;  %v738_v25 = vmul.f32 %v717_v21, %v682_v13  ;;  %v685_v26 = vld [vmem:[#allocation2 + $0x38] sm:$0xff] }
 0x13e   : > { %v750_v5 = vadd.f32 %v742_v0, %v734_v1  ;;  %v735_v11 = vmul.f32 %v702_v9, %v679_v3  ;;  %v683_v12 = vld [vmem:[#allocation2 + $0x28] sm:$0xff]  ;;  %v741_v38 = vmul.f32 %v732_v33, %v685_v26  ;;  %v756_v41 = vadd.f32 %v748_v34, %v740_v39 }
 0x13f   : > { %v753_v14 = vadd.f32 %v745_v6, %v737_v10  ;;  %v760_v16 = vmax.f32 %v752_v4, 0.0  ;;  %v739_v24 = vmul.f32 %v722_v19, %v683_v12  ;;  %v754_v29 = vadd.f32 %v746_v20, %v738_v25 }
 0x140   : > { %v751_v15 = vadd.f32 %v743_v8, %v735_v11  ;;  %v758_v17 = vmax.f32 %v750_v5, 0.0  ;;  %v757_v40 = vadd.f32 %v749_v32, %v741_v38  ;;  %v764_v44 = vmax.f32 %v756_v41, 0.0 }
 0x141   : > { %v761_v22 = vmax.f32 %v753_v14, 0.0  ;;  %v755_v28 = vadd.f32 %v747_v18, %v739_v24  ;;  %v762_v37 = vmax.f32 %v754_v29, 0.0 }
 0x142   : > { %v759_v23 = vmax.f32 %v751_v15, 0.0  ;;  %v765_v43 = vmax.f32 %v757_v40, 0.0 }
 0x143   : > { %v767_v31 = vpack.c.bf16 %v761_v22, %v760_v16  ;;  %v763_v36 = vmax.f32 %v755_v28, 0.0 }
 0x144   : > { %v766_v30 = vpack.c.bf16 %v759_v23, %v758_v17  ;;  %v769_v45 = vpack.c.bf16 %v765_v43, %v764_v44 }
 0x145   : > { %v768_v42 = vpack.c.bf16 %v763_v36, %v762_v37 }
 0x146   : > { %1264 = vmatprep.mubr.msk.bf16.mxu0 %vm665_vm1, %v766_v30  ;;  %1276 = vmatprep.mubr.msk.bf16.mxu1 %vm665_vm1, %v766_v30 }
 0x147   : > { %1265 = vmatmul.mubr.msk.bf16.vlgmr.msra.gmra.mrb[0].mxu0 %vm665_vm1, %v767_v31  ;;  %1277 = vmatmul.mubr.msk.bf16.vlgmr.msra.gmra.mrb[0].mxu1 %vm665_vm1, %v767_v31 }
 0x148   : > { %1268 = vmatprep.mubr.msk.bf16.mxu0 %vm665_vm1, %v768_v42  ;;  %1280 = vmatprep.mubr.msk.bf16.mxu1 %vm665_vm1, %v768_v42 }
 0x14f   : > { %1269 = vmatmul.mubr.msk.bf16.gmra.mrb[4].mxu0 %vm665_vm1, %v769_v45  ;;  %1281 = vmatmul.mubr.msk.bf16.gmra.mrb[4].mxu1 %vm665_vm1, %v769_v45 }
 0x21a   : > { %v1266_v47 = vpop.f32.mrb[0].mxu0  ;;  %v1278_v48 = vpop.f32.mrb[0].mxu1 }
 0x21b   : > { %v1206_v49 = vpack.c.bf16 %v1266_v47, %v1266_v47  ;;  %v970_v50 = vadd.f32 %v1278_v48, %v1194_v46  ;;  %v832_v51 = vpop.f32.mrb[1].mxu0  ;;  %v961_v52 = vpop.f32.mrb[1].mxu1 }
 0x21c   : > { %v1204_v53 = vpack.c.bf16 %v832_v51, %v832_v51  ;;  %v962_v54 = vadd.f32 %v1194_v46, %v961_v52  ;;  %v1267_v55 = vpop.f32.mrb[2].mxu0  ;;  %v1279_v56 = vpop.f32.mrb[2].mxu1 }
 0x21d   : > { %898 = vst.msk [vmem:[%s1562_s12 + $0x8] sm:$0xf] %vm895_vm2, %v1206_v49  ;;  %v1207_v57 = vpack.c.bf16 %v1267_v55, %v1267_v55  ;;  %v973_v58 = vadd.f32 %v1279_v56, %v1194_v46  ;;  %v835_v59 = vpop.f32.mrb[3].mxu0  ;;  %v964_v60 = vpop.f32.mrb[3].mxu1 }
 0x21e   : > { %994 = vst.msk [vmem:[%s1567_s22 + $0x10] sm:$0xff] %vm665_vm1, %v970_v50  ;;  %992 = vst.msk [vmem:[%s1567_s22] sm:$0xff] %vm665_vm1, %v962_v54  ;;  %v1205_v61 = vpack.c.bf16 %v835_v59, %v835_v59  ;;  %v965_v62 = vadd.f32 %v1194_v46, %v964_v60 }
 0x21f   : > { %896 = vst.msk [vmem:[%s1562_s12] sm:$0xf] %vm895_vm2, %v1204_v53  ;;  %899 = vst.msk [vmem:[%s1562_s12 + $0xc] sm:$0xf] %vm895_vm2, %v1207_v57 }
 0x220   : > { %995 = vst.msk [vmem:[%s1567_s22 + $0x18] sm:$0xff] %vm665_vm1, %v973_v58  ;;  %993 = vst.msk [vmem:[%s1567_s22 + $0x8] sm:$0xff] %vm665_vm1, %v965_v62 }
 0x221   : > { %897 = vst.msk [vmem:[%s1562_s12 + $0x4] sm:$0xf] %vm895_vm2, %v1205_v61 }
 0x222   : > { %v1270_v63 = vpop.f32.mrb[4].mxu0  ;;  %v1282_v0 = vpop.f32.mrb[4].mxu1 }
 0x223   : > { %v1210_v1 = vpack.c.bf16 %v1270_v63, %v1270_v63  ;;  %v986_v2 = vadd.f32 %v1282_v0, %v1194_v46  ;;  %v848_v3 = vpop.f32.mrb[5].mxu0  ;;  %v977_v4 = vpop.f32.mrb[5].mxu1 }
 0x224   : > { %v1208_v5 = vpack.c.bf16 %v848_v3, %v848_v3  ;;  %v978_v6 = vadd.f32 %v1194_v46, %v977_v4  ;;  %v1271_v7 = vpop.f32.mrb[6].mxu0  ;;  %v1283_v8 = vpop.f32.mrb[6].mxu1 }
 0x225   : > { %902 = vst.msk [vmem:[%s1562_s12 + $0x18] sm:$0xf] %vm895_vm2, %v1210_v1  ;;  %v1211_v9 = vpack.c.bf16 %v1271_v7, %v1271_v7  ;;  %v989_v10 = vadd.f32 %v1283_v8, %v1194_v46  ;;  %v851_v11 = vpop.f32.mrb[7].mxu0  ;;  %v980_v12 = vpop.f32.mrb[7].mxu1 }
 0x226   : > { %998 = vst.msk [vmem:[%s1567_s22 + $0x30] sm:$0xff] %vm665_vm1, %v986_v2  ;;  %996 = vst.msk [vmem:[%s1567_s22 + $0x20] sm:$0xff] %vm665_vm1, %v978_v6  ;;  %v1209_v13 = vpack.c.bf16 %v851_v11, %v851_v11  ;;  %v981_v14 = vadd.f32 %v1194_v46, %v980_v12 }
 0x227   : > { %900 = vst.msk [vmem:[%s1562_s12 + $0x10] sm:$0xf] %vm895_vm2, %v1208_v5  ;;  %903 = vst.msk [vmem:[%s1562_s12 + $0x1c] sm:$0xf] %vm895_vm2, %v1211_v9 }
 0x228   : > { %999 = vst.msk [vmem:[%s1567_s22 + $0x38] sm:$0xff] %vm665_vm1, %v989_v10  ;;  %997 = vst.msk [vmem:[%s1567_s22 + $0x28] sm:$0xff] %vm665_vm1, %v981_v14 }
 0x229   : > { %901 = vst.msk [vmem:[%s1562_s12 + $0x14] sm:$0xf] %vm895_vm2, %v1209_v13 }
 0x22a PF: > { %s19_s11 = sadd.s32 1, %s1430_s11   ;;  %s1700_s15 = sld [smem:[#allocation4_spill]] }
 0x22b   : > { %p16_p0 = scmp.ge.s32.totalorder %s19_s11, 10   ;;  %s1701_s16 = sld [smem:[#allocation5_spill]] }
 0x22c   : > { %s1702_s27 = smov %s1410_s28  ;;  %s1703_s28 = smov %s1530_s18 }
 0x22d   : > { %s1704_s29 = smov %s1422_s9  ;;  %s1705_s30 = smov %s1426_s10 }
 0x22e   :  { %18 = sbr.rel (!%p16_p0) target bundleno = 6 (0x6), region = 153 }
 0x230   : > { %s1706_s9 = smov %s1700_s15 }
 0x231   : > { %s1707_s10 = smov %s1701_s16 }

</bundles_post_ra>
